<compile_context>
chip_gen: v7x
topology: tpu7x:2x2x1
jax: 0.10.0
libtpu: 0.0.40
codegen_flags: <defaults>
</compile_context>

<pallas_src>
import jax
import jax.numpy as jnp
from jax.experimental import pallas as pl
from jax.experimental.pallas import tpu as pltpu

# ----------------------------- configuration ------------------------------
BATCH = 16                 # small test batch (padded to a multiple of TILE_B)
IN_FEATURES = 8
CONTEXT_FEATURES = 4
HIDDEN_FEATURES = 32
OUT_FEATURES = 8
NUM_BLOCKS = 2
LAYER_NUM = 2              # per-block linear layers (matches PyTorch default)

LANE = 128                 # TPU lane width; every feature dim is padded to it
TILE_B = 16                # bf16-native (16,128) tile; raise to 256-512 for
                           # real batch sizes (grid = cdiv(B, TILE_B))

N_WMATS = 1 + 3 * NUM_BLOCKS + 1   # initial + per-block 3 + final
N_BIAS = 1 + 3 * NUM_BLOCKS + 1
B_ROWS = ((N_BIAS + 7) // 8) * 8   # sublane-pad bias slab rows

# Lane layout inside the packed input tile / activation tiles:
#   lanes [0 : IN)                        : x  (also: activations t / temps)
#   lanes [IN : IN+CTX)                   : ctx
#   lanes [HIDDEN : 2*HIDDEN)             : ct (context-branch output)
_CTX_LO = IN_FEATURES
_CTX_HI = IN_FEATURES + CONTEXT_FEATURES


# ------------------------------- kernel -----------------------------------
def residual_net_kernel(xc_ref, w_ref, b_ref, out_ref):
    """Full ResidualNet forward on one (TILE_B, 128) batch tile.

    xc_ref  : (TILE_B, 128) bf16; x in lanes 0:IN, ctx in lanes IN:IN+CTX,
              zero elsewhere.
    w_ref   : (N_WMATS, 128, 128) bf16 packed weight slab ((in, out) layout).
    b_ref   : (B_ROWS, 128) f32 packed bias slab.
    out_ref : (TILE_B, 128) f32 lane-dense output tile.
    """

    def wmat(i):                       # static index -> (128, 128) bf16
        return w_ref[i]

    def bias(i):                       # static slice -> (1, 128) f32
        return b_ref[i:i + 1, :]

    def mm(a_bf16, wi):                # MXU matmul, f32 accumulation
        return jnp.dot(a_bf16, wmat(wi), preferred_element_type=jnp.float32)

    relu = lambda v: jnp.maximum(v, 0.0)
    bf16 = lambda v: v.astype(jnp.bfloat16)

    xc = xc_ref[...]                   # bf16, loaded once; carries x and ctx

    # --- hoisted ctx-only branch: all blocks' context projections are
    # independent of the residual state, issue them back-to-back so the MXU
    # can pipeline them.  Each ct_k lives in lanes HIDDEN:2*HIDDEN (weights
    # packed that way), so cat(t, ct) later is a disjoint-lane add.
    cts = [relu(mm(xc, 1 + 3 * k) + bias(1 + 3 * k)) for k in range(NUM_BLOCKS)]

    # initial_layer(cat(x, ctx)): single matmul (x-rows and ctx-rows of the
    # weight were packed into one block at init time).  Result in lanes 0:H.
    temps = mm(xc, 0) + bias(0)                        # (TILE_B, 128) f32

    for k in range(NUM_BLOCKS):
        w0, w1 = 2 + 3 * k, 3 + 3 * k
        b0, b1 = 2 + 3 * k, 3 + 3 * k

        inputs = temps
        # linear_layers[0](relu(inputs))                 -> lanes 0:H
        t = mm(bf16(relu(inputs)), w0) + bias(b0)
        # dropout(p=0) -> relu -> linear_layers[1] on cat(t, ct):
        # t occupies lanes 0:H, ct_k occupies lanes H:2H, so the concat is a
        # single VPU add and w1 is ONE block (rows 0:H = t-part, H:2H = ct-part).
        # relu(ct)==ct (already a relu output), so relu(t + ct) is exact.
        t = mm(bf16(relu(t + cts[k])), w1) + bias(b1)
        temps = inputs + t

    # final_layer (no activation)
    wi_f = 1 + 3 * NUM_BLOCKS
    out_ref[...] = (mm(bf16(temps), wi_f) + bias(wi_f)).astype(out_ref.dtype)


# ------------------------------- wrapper -----------------------------------
def residual_net_forward(x, ctx, w_slab, b_slab, tile_b=TILE_B):
    batch = x.shape[0]
    b_pad = ((batch + tile_b - 1) // tile_b) * tile_b

    # Lane-pack x (lanes 0:IN) and ctx (lanes IN:IN+CTX) into ONE bf16 tile;
    # zero pad rows beyond the real batch are sliced off below.
    xc = jnp.zeros((b_pad, LANE), jnp.bfloat16)
    xc = xc.at[:batch, :IN_FEATURES].set(x.astype(jnp.bfloat16))
    xc = xc.at[:batch, _CTX_LO:_CTX_HI].set(ctx.astype(jnp.bfloat16))

    grid = (b_pad // tile_b,)
    out = pl.pallas_call(
        residual_net_kernel,
        out_shape=jax.ShapeDtypeStruct((b_pad, LANE), jnp.float32),
        grid=grid,
        in_specs=[
            pl.BlockSpec((tile_b, LANE), lambda i: (i, 0)),       # packed x|ctx
            pl.BlockSpec(w_slab.shape, lambda i: (0, 0, 0)),      # weight slab
            pl.BlockSpec(b_slab.shape, lambda i: (0, 0)),         # bias slab
        ],
        out_specs=pl.BlockSpec((tile_b, LANE), lambda i: (i, 0)),
        compiler_params=pltpu.CompilerParams(
            dimension_semantics=("parallel",)),   # megacore-shard batch grid
    )(xc, w_slab, b_slab)
    return out[:batch, :OUT_FEATURES]


# --------------------------- parameter creation ----------------------------
def _linear_params(key, fan_in, fan_out, zero_init=False):
    kw, kb = jax.random.split(key)
    bound = 0.001 if zero_init else 1.0 / (fan_in ** 0.5)
    w = jax.random.uniform(kw, (fan_out, fan_in), jnp.float32, -bound, bound)
    b = jax.random.uniform(kb, (1, fan_out), jnp.float32, -bound, bound)
    return w, b


def make_params(key):
    n_keys = 1 + 3 * NUM_BLOCKS + 1
    keys = jax.random.split(key, n_keys)
    k = iter(keys)
    params = []
    # initial_layer: (in + ctx) -> hidden
    params.append(_linear_params(next(k), IN_FEATURES + CONTEXT_FEATURES,
                                 HIDDEN_FEATURES))
    for _ in range(NUM_BLOCKS):
        # context_layer: ctx -> hidden
        params.append(_linear_params(next(k), CONTEXT_FEATURES, HIDDEN_FEATURES))
        # linear_layers[0]: hidden -> hidden
        params.append(_linear_params(next(k), HIDDEN_FEATURES, HIDDEN_FEATURES))
        # linear_layers[1]: 2*hidden -> hidden, zero-ish init per reference
        params.append(_linear_params(next(k), 2 * HIDDEN_FEATURES,
                                     HIDDEN_FEATURES, zero_init=True))
    # final_layer: hidden -> out
    params.append(_linear_params(next(k), HIDDEN_FEATURES, OUT_FEATURES))
    return params


def pack_params(params):
    """One-time packing: transpose (out,in)->(in,out), zero-pad into 128x128
    blocks with lane-packed row/column placement so no concats or split
    matmuls are needed in the kernel:
      * initial layer:  x-rows at 0:IN, ctx-rows at IN:IN+CTX, cols 0:H
      * context layers: rows IN:IN+CTX (where ctx lives), cols H:2H
      * linear0:        rows 0:H, cols 0:H
      * linear1:        rows 0:H = t-part, rows H:2H = ct-part, cols 0:H
      * final layer:    rows 0:H, cols 0:OUT
    """
    H = HIDDEN_FEATURES
    w_blocks, b_rows = [], []

    def new_w():
        return jnp.zeros((LANE, LANE), jnp.float32)

    def new_b():
        return jnp.zeros((1, LANE), jnp.float32)

    it = iter(params)

    # initial layer: one block holding both the x-part and ctx-part rows.
    w, b = next(it)
    wt = jnp.transpose(w)                                    # (IN+CTX, H)
    blk = new_w().at[:IN_FEATURES + CONTEXT_FEATURES, :H].set(wt)
    w_blocks.append(blk)
    b_rows.append(new_b().at[:, :H].set(b))

    for _ in range(NUM_BLOCKS):
        wc, bc = next(it)
        w0, b0 = next(it)
        w1, b1 = next(it)
        # context_layer: rows aligned with ctx's lane range, output cols H:2H
        blk = new_w().at[_CTX_LO:_CTX_HI, H:2 * H].set(jnp.transpose(wc))
        w_blocks.append(blk)
        b_rows.append(new_b().at[:, H:2 * H].set(bc))
        # linear_layers[0]
        blk = new_w().at[:H, :H].set(jnp.transpose(w0))
        w_blocks.append(blk)
        b_rows.append(new_b().at[:, :H].set(b0))
        # linear_layers[1]: rows 0:H consume t, rows H:2H consume ct
        blk = new_w().at[:2 * H, :H].set(jnp.transpose(w1))
        w_blocks.append(blk)
        b_rows.append(new_b().at[:, :H].set(b1))

    wf, bfin = next(it)
    blk = new_w().at[:H, :OUT_FEATURES].set(jnp.transpose(wf))
    w_blocks.append(blk)
    b_rows.append(new_b().at[:, :OUT_FEATURES].set(bfin))

    w_slab = jnp.stack(w_blocks, axis=0).astype(jnp.bfloat16)   # (N,128,128)
    while len(b_rows) < B_ROWS:
        b_rows.append(new_b())
    b_slab = jnp.concatenate(b_rows, axis=0)                    # (B_ROWS,128)
    return w_slab, b_slab


# --------------------------- pure-JAX reference ----------------------------
def reference_forward(x, ctx, params):
    # Mirrors the kernel numerics: bf16 matmul inputs, f32 accumulation,
    # f32 elementwise.
    def lin(a, wb):
        w, b = wb
        return jnp.dot(a.astype(jnp.bfloat16),
                       jnp.transpose(w).astype(jnp.bfloat16),
                       preferred_element_type=jnp.float32) + b

    it = iter(params)
    temps = lin(jnp.concatenate([x, ctx], axis=1), next(it))
    for _ in range(NUM_BLOCKS):
        cwb, w0b, w1b = next(it), next(it), next(it)
        inputs = temps
        t = lin(jax.nn.relu(inputs), w0b)
        ct = jax.nn.relu(lin(ctx, cwb))
        t = lin(jax.nn.relu(jnp.concatenate([t, ct], axis=1)), w1b)
        temps = inputs + t
    return lin(temps, next(it))


# --------------------------------- main ------------------------------------
if __name__ == "__main__":
    key = jax.random.PRNGKey(0)
    kx, kc, kp = jax.random.split(key, 3)

    x = jax.random.normal(kx, (BATCH, IN_FEATURES), jnp.float32)
    ctx = jax.random.normal(kc, (BATCH, CONTEXT_FEATURES), jnp.float32)
    params = make_params(kp)
    w_slab, b_slab = pack_params(params)        # packed once at init time

    out = residual_net_forward(x, ctx, w_slab, b_slab)
    out = jax.block_until_ready(out)

    ref = reference_forward(x, ctx, params)
    assert out.shape == (BATCH, OUT_FEATURES)
    assert jnp.allclose(out, ref, atol=1e-3, rtol=1e-3), "mismatch vs JAX reference"

    print("KERNEL_OK")
</pallas_src>

<mosaic_0001>
module attributes {stable_mosaic.version = 11 : i64} {
  func.func @residual_net_kernel(%arg0: i32, %arg1: memref<16x128xbf16, #tpu.memory_space<vmem>>, %arg2: memref<8x128x128xbf16, #tpu.memory_space<vmem>>, %arg3: memref<8x128xf32, #tpu.memory_space<vmem>>, %arg4: memref<16x128xf32, #tpu.memory_space<vmem>>) attributes {dimension_semantics = [#tpu.dimension_semantics<parallel>], iteration_bounds = array<i64: 1>, scalar_prefetch = 0 : i64, scratch_operands = 0 : i64, tpu.core_type = #tpu.core_type<tc>, window_params = [{transform_indices = @transform_0, window_bounds = array<i64: 16, 128>}, {pipeline_mode = #tpu.pipeline_mode<synchronous>, transform_indices = @transform_1, window_bounds = array<i64: 8, 128, 128>}, {pipeline_mode = #tpu.pipeline_mode<synchronous>, transform_indices = @transform_2, window_bounds = array<i64: 8, 128>}, {transform_indices = @transform_3, window_bounds = array<i64: 16, 128>}]} {
    %c0 = arith.constant 0 : index
    %c0_0 = arith.constant 0 : index
    %0 = vector.load %arg1[%c0, %c0_0] : memref<16x128xbf16, #tpu.memory_space<vmem>>, vector<16x128xbf16>
    %c1 = arith.constant 1 : index
    %c0_1 = arith.constant 0 : index
    %c0_2 = arith.constant 0 : index
    %1 = vector.load %arg2[%c1, %c0_1, %c0_2] : memref<8x128x128xbf16, #tpu.memory_space<vmem>>, vector<1x128x128xbf16>
    %2 = vector.shape_cast %1 : vector<1x128x128xbf16> to vector<128x128xbf16>
    %cst = arith.constant dense<0.000000e+00> : vector<16x128xf32>
    %3 = tpu.matmul %0, %2, %cst {dimension_numbers = #tpu.dot_dimension_numbers<[1], [0], [0], [1], [0, 0, 1, 1], [], []>} : vector<16x128xbf16>, vector<128x128xbf16>, vector<16x128xf32> -> vector<16x128xf32>
    %c1_3 = arith.constant 1 : index
    %c0_4 = arith.constant 0 : index
    %4 = vector.load %arg3[%c1_3, %c0_4] : memref<8x128xf32, #tpu.memory_space<vmem>>, vector<1x128xf32>
    %5 = vector.broadcast %4 : vector<1x128xf32> to vector<16x128xf32>
    %6 = arith.addf %3, %5 : vector<16x128xf32>
    %cst_5 = arith.constant 0.000000e+00 : f32
    %7 = vector.broadcast %cst_5 : f32 to vector<16x128xf32>
    %8 = arith.maximumf %6, %7 : vector<16x128xf32>
    %c4 = arith.constant 4 : index
    %c0_6 = arith.constant 0 : index
    %c0_7 = arith.constant 0 : index
    %9 = vector.load %arg2[%c4, %c0_6, %c0_7] : memref<8x128x128xbf16, #tpu.memory_space<vmem>>, vector<1x128x128xbf16>
    %10 = vector.shape_cast %9 : vector<1x128x128xbf16> to vector<128x128xbf16>
    %cst_8 = arith.constant dense<0.000000e+00> : vector<16x128xf32>
    %11 = tpu.matmul %0, %10, %cst_8 {dimension_numbers = #tpu.dot_dimension_numbers<[1], [0], [0], [1], [0, 0, 1, 1], [], []>} : vector<16x128xbf16>, vector<128x128xbf16>, vector<16x128xf32> -> vector<16x128xf32>
    %c4_9 = arith.constant 4 : index
    %c0_10 = arith.constant 0 : index
    %12 = vector.load %arg3[%c4_9, %c0_10] : memref<8x128xf32, #tpu.memory_space<vmem>>, vector<1x128xf32>
    %13 = vector.broadcast %12 : vector<1x128xf32> to vector<16x128xf32>
    %14 = arith.addf %11, %13 : vector<16x128xf32>
    %cst_11 = arith.constant 0.000000e+00 : f32
    %15 = vector.broadcast %cst_11 : f32 to vector<16x128xf32>
    %16 = arith.maximumf %14, %15 : vector<16x128xf32>
    %c0_12 = arith.constant 0 : index
    %c0_13 = arith.constant 0 : index
    %c0_14 = arith.constant 0 : index
    %17 = vector.load %arg2[%c0_12, %c0_13, %c0_14] : memref<8x128x128xbf16, #tpu.memory_space<vmem>>, vector<1x128x128xbf16>
    %18 = vector.shape_cast %17 : vector<1x128x128xbf16> to vector<128x128xbf16>
    %cst_15 = arith.constant dense<0.000000e+00> : vector<16x128xf32>
    %19 = tpu.matmul %0, %18, %cst_15 {dimension_numbers = #tpu.dot_dimension_numbers<[1], [0], [0], [1], [0, 0, 1, 1], [], []>} : vector<16x128xbf16>, vector<128x128xbf16>, vector<16x128xf32> -> vector<16x128xf32>
    %c0_16 = arith.constant 0 : index
    %c0_17 = arith.constant 0 : index
    %20 = vector.load %arg3[%c0_16, %c0_17] : memref<8x128xf32, #tpu.memory_space<vmem>>, vector<1x128xf32>
    %21 = vector.broadcast %20 : vector<1x128xf32> to vector<16x128xf32>
    %22 = arith.addf %19, %21 : vector<16x128xf32>
    %cst_18 = arith.constant 0.000000e+00 : f32
    %23 = vector.broadcast %cst_18 : f32 to vector<16x128xf32>
    %24 = arith.maximumf %22, %23 : vector<16x128xf32>
    %25 = arith.truncf %24 : vector<16x128xf32> to vector<16x128xbf16>
    %c2 = arith.constant 2 : index
    %c0_19 = arith.constant 0 : index
    %c0_20 = arith.constant 0 : index
    %26 = vector.load %arg2[%c2, %c0_19, %c0_20] : memref<8x128x128xbf16, #tpu.memory_space<vmem>>, vector<1x128x128xbf16>
    %27 = vector.shape_cast %26 : vector<1x128x128xbf16> to vector<128x128xbf16>
    %cst_21 = arith.constant dense<0.000000e+00> : vector<16x128xf32>
    %28 = tpu.matmul %25, %27, %cst_21 {dimension_numbers = #tpu.dot_dimension_numbers<[1], [0], [0], [1], [0, 0, 1, 1], [], []>} : vector<16x128xbf16>, vector<128x128xbf16>, vector<16x128xf32> -> vector<16x128xf32>
    %c2_22 = arith.constant 2 : index
    %c0_23 = arith.constant 0 : index
    %29 = vector.load %arg3[%c2_22, %c0_23] : memref<8x128xf32, #tpu.memory_space<vmem>>, vector<1x128xf32>
    %30 = vector.broadcast %29 : vector<1x128xf32> to vector<16x128xf32>
    %31 = arith.addf %28, %30 : vector<16x128xf32>
    %32 = arith.addf %31, %8 : vector<16x128xf32>
    %cst_24 = arith.constant 0.000000e+00 : f32
    %33 = vector.broadcast %cst_24 : f32 to vector<16x128xf32>
    %34 = arith.maximumf %32, %33 : vector<16x128xf32>
    %35 = arith.truncf %34 : vector<16x128xf32> to vector<16x128xbf16>
    %c3 = arith.constant 3 : index
    %c0_25 = arith.constant 0 : index
    %c0_26 = arith.constant 0 : index
    %36 = vector.load %arg2[%c3, %c0_25, %c0_26] : memref<8x128x128xbf16, #tpu.memory_space<vmem>>, vector<1x128x128xbf16>
    %37 = vector.shape_cast %36 : vector<1x128x128xbf16> to vector<128x128xbf16>
    %cst_27 = arith.constant dense<0.000000e+00> : vector<16x128xf32>
    %38 = tpu.matmul %35, %37, %cst_27 {dimension_numbers = #tpu.dot_dimension_numbers<[1], [0], [0], [1], [0, 0, 1, 1], [], []>} : vector<16x128xbf16>, vector<128x128xbf16>, vector<16x128xf32> -> vector<16x128xf32>
    %c3_28 = arith.constant 3 : index
    %c0_29 = arith.constant 0 : index
    %39 = vector.load %arg3[%c3_28, %c0_29] : memref<8x128xf32, #tpu.memory_space<vmem>>, vector<1x128xf32>
    %40 = vector.broadcast %39 : vector<1x128xf32> to vector<16x128xf32>
    %41 = arith.addf %38, %40 : vector<16x128xf32>
    %42 = arith.addf %22, %41 : vector<16x128xf32>
    %cst_30 = arith.constant 0.000000e+00 : f32
    %43 = vector.broadcast %cst_30 : f32 to vector<16x128xf32>
    %44 = arith.maximumf %42, %43 : vector<16x128xf32>
    %45 = arith.truncf %44 : vector<16x128xf32> to vector<16x128xbf16>
    %c5 = arith.constant 5 : index
    %c0_31 = arith.constant 0 : index
    %c0_32 = arith.constant 0 : index
    %46 = vector.load %arg2[%c5, %c0_31, %c0_32] : memref<8x128x128xbf16, #tpu.memory_space<vmem>>, vector<1x128x128xbf16>
    %47 = vector.shape_cast %46 : vector<1x128x128xbf16> to vector<128x128xbf16>
    %cst_33 = arith.constant dense<0.000000e+00> : vector<16x128xf32>
    %48 = tpu.matmul %45, %47, %cst_33 {dimension_numbers = #tpu.dot_dimension_numbers<[1], [0], [0], [1], [0, 0, 1, 1], [], []>} : vector<16x128xbf16>, vector<128x128xbf16>, vector<16x128xf32> -> vector<16x128xf32>
    %c5_34 = arith.constant 5 : index
    %c0_35 = arith.constant 0 : index
    %49 = vector.load %arg3[%c5_34, %c0_35] : memref<8x128xf32, #tpu.memory_space<vmem>>, vector<1x128xf32>
    %50 = vector.broadcast %49 : vector<1x128xf32> to vector<16x128xf32>
    %51 = arith.addf %48, %50 : vector<16x128xf32>
    %52 = arith.addf %51, %16 : vector<16x128xf32>
    %cst_36 = arith.constant 0.000000e+00 : f32
    %53 = vector.broadcast %cst_36 : f32 to vector<16x128xf32>
    %54 = arith.maximumf %52, %53 : vector<16x128xf32>
    %55 = arith.truncf %54 : vector<16x128xf32> to vector<16x128xbf16>
    %c6 = arith.constant 6 : index
    %c0_37 = arith.constant 0 : index
    %c0_38 = arith.constant 0 : index
    %56 = vector.load %arg2[%c6, %c0_37, %c0_38] : memref<8x128x128xbf16, #tpu.memory_space<vmem>>, vector<1x128x128xbf16>
    %57 = vector.shape_cast %56 : vector<1x128x128xbf16> to vector<128x128xbf16>
    %cst_39 = arith.constant dense<0.000000e+00> : vector<16x128xf32>
    %58 = tpu.matmul %55, %57, %cst_39 {dimension_numbers = #tpu.dot_dimension_numbers<[1], [0], [0], [1], [0, 0, 1, 1], [], []>} : vector<16x128xbf16>, vector<128x128xbf16>, vector<16x128xf32> -> vector<16x128xf32>
    %c6_40 = arith.constant 6 : index
    %c0_41 = arith.constant 0 : index
    %59 = vector.load %arg3[%c6_40, %c0_41] : memref<8x128xf32, #tpu.memory_space<vmem>>, vector<1x128xf32>
    %60 = vector.broadcast %59 : vector<1x128xf32> to vector<16x128xf32>
    %61 = arith.addf %58, %60 : vector<16x128xf32>
    %62 = arith.addf %42, %61 : vector<16x128xf32>
    %63 = arith.truncf %62 : vector<16x128xf32> to vector<16x128xbf16>
    %c7 = arith.constant 7 : index
    %c0_42 = arith.constant 0 : index
    %c0_43 = arith.constant 0 : index
    %64 = vector.load %arg2[%c7, %c0_42, %c0_43] : memref<8x128x128xbf16, #tpu.memory_space<vmem>>, vector<1x128x128xbf16>
    %65 = vector.shape_cast %64 : vector<1x128x128xbf16> to vector<128x128xbf16>
    %cst_44 = arith.constant dense<0.000000e+00> : vector<16x128xf32>
    %66 = tpu.matmul %63, %65, %cst_44 {dimension_numbers = #tpu.dot_dimension_numbers<[1], [0], [0], [1], [0, 0, 1, 1], [], []>} : vector<16x128xbf16>, vector<128x128xbf16>, vector<16x128xf32> -> vector<16x128xf32>
    %c7_45 = arith.constant 7 : index
    %c0_46 = arith.constant 0 : index
    %67 = vector.load %arg3[%c7_45, %c0_46] : memref<8x128xf32, #tpu.memory_space<vmem>>, vector<1x128xf32>
    %68 = vector.broadcast %67 : vector<1x128xf32> to vector<16x128xf32>
    %69 = arith.addf %66, %68 : vector<16x128xf32>
    %c0_47 = arith.constant 0 : index
    %c0_48 = arith.constant 0 : index
    %70 = vector.load %arg4[%c0_47, %c0_48] : memref<16x128xf32, #tpu.memory_space<vmem>>, vector<16x128xf32>
    tpu.vector_store %arg4[%c0_47, %c0_48], %69 {strides = array<i32>} : memref<16x128xf32, #tpu.memory_space<vmem>>, vector<16x128xf32>,
    return
  }
  func.func @transform_0(%arg0: i32) -> (i32, i32) {
    %c0_i32 = arith.constant 0 : i32
    %c0_i32_0 = arith.constant 0 : i32
    return %arg0, %c0_i32 : i32, i32
  }
  func.func @transform_1(%arg0: i32) -> (i32, i32, i32) {
    %c0_i32 = arith.constant 0 : i32
    %c0_i32_0 = arith.constant 0 : i32
    %c0_i32_1 = arith.constant 0 : i32
    %c0_i32_2 = arith.constant 0 : i32
    return %c0_i32, %c0_i32_0, %c0_i32_1 : i32, i32, i32
  }
  func.func @transform_2(%arg0: i32) -> (i32, i32) {
    %c0_i32 = arith.constant 0 : i32
    %c0_i32_0 = arith.constant 0 : i32
    %c0_i32_1 = arith.constant 0 : i32
    return %c0_i32, %c0_i32_0 : i32, i32
  }
  func.func @transform_3(%arg0: i32) -> (i32, i32) {
    %c0_i32 = arith.constant 0 : i32
    %c0_i32_0 = arith.constant 0 : i32
    return %arg0, %c0_i32 : i32, i32
  }
}

</mosaic_0001>

<bundles_post_ra>
// kernel: tpu_custom_call.1
= control target key start
LH: loop header
LB: loop body
LE: loop exit
PB: predicated region body
PF: predicated region fallthrough
CT: control target
= control target key end

     0   :  { %8 = vsyncpa [#allocation3], 0  ;;  %s1656_s0 = inlined_call_operand.hbm [shape: bf16[16,128], index: 0, kind: input, shape index: {}]   ;;  %s1657_s1 = inlined_call_operand.hbm [shape: bf16[8,128,128], index: 1, kind: input, shape index: {}]   ;;  %s1658_s2 = inlined_call_operand.hbm [shape: f32[8,128], index: 2, kind: input, shape index: {}]   ;;  %s1659_s3 = inlined_call_operand.hbm [shape: f32[16,128], index: 3, kind: output, shape index: {}]  }
   0x1   :  { %9 = vsyncpa [#allocation6], 0 }
   0x2   :  { %10 = vsyncpa [#allocation4], 0  ;;  %s1469_s12 = smov [#allocation5]   ;;  %s1470_s14 = smov [#allocation2]  }
   0x3   :  { %s28_s13 = sshll.u32 %s1469_s12, 4  ;;  %s16_s15 = sshll.u32 %s1470_s14, 4  ;;  %s29_s13 = int_to_ptr.vmem [resolvable:$true] %s28_s13  ;;  %s1499_s15 = int_to_ptr.vmem [resolvable:$true] %s16_s15 }
   0x4   :  { %s1375_s18 = scalar_lea.hbm %s1657_s1, 8192 }
   0x5   :  { %p1376_p0 = scmp.ne.s32.totalorder %s1657_s1, %s1375_s18  ;;  %p1379_p1 = scmp.lt.u32.totalorder %s1375_s18, %s1657_s1 }
   0x7   :  { %p1381_p2 = pnand %p1379_p1, %p1376_p0 }
   0x9   :  { %1384 = shalt.err (!%p1381_p2)
}
   0xa   :  { %s1385_s23 = scalar_lea.vmem %s29_s13, 8192  ;;  %p1390_p4 = scmp.lt.s32.totalorder %s29_s13, %s29_s13 }
   0xb   :  { %p1386_p3 = scmp.ne.s32.totalorder %s29_s13, %s1385_s23  ;;  %p1391_p5 = scmp.lt.s32.totalorder %s1385_s23, %s1385_s23 }
   0xd   :  { %p1392_p6 = por %p1391_p5, %p1390_p4 }
   0xf   :  { %p1393_p7 = pnand %p1392_p6, %p1386_p3 }
  0x11   :  { %1396 = shalt.err (!%p1393_p7)
}
  0x12   :  { %s1471_s24 = smov 64   ;;  %s1472_s25 = smov 4  }
  0x13   :  { %34 = dma.hbm_to_vmem [thread:$0]  %s1657_s1, 8192, %s29_s13, [#allocation6], %s1471_s24, %s1471_s24, %s1472_s25  }
  0x14   :  { %s1397_s30 = scalar_lea.hbm %s1656_s0, 128 }
  0x15   :  { %p1398_p8 = scmp.ne.s32.totalorder %s1656_s0, %s1397_s30  ;;  %p1401_p9 = scmp.lt.u32.totalorder %s1397_s30, %s1656_s0 }
  0x17   :  { %p1403_p10 = pnand %p1401_p9, %p1398_p8 }
  0x19   :  { %1406 = shalt.err (!%p1403_p10)
}
  0x1a   :  { %s1407_s8 = scalar_lea.vmem %s1499_s15, 128  ;;  %p1412_p12 = scmp.lt.s32.totalorder %s1499_s15, %s1499_s15 }
  0x1b   :  { %p1408_p11 = scmp.ne.s32.totalorder %s1499_s15, %s1407_s8  ;;  %p1413_p13 = scmp.lt.s32.totalorder %s1407_s8, %s1407_s8 }
  0x1d   :  { %p1414_p0 = por %p1413_p13, %p1412_p12 }
  0x1f   :  { %p1415_p1 = pnand %p1414_p0, %p1408_p11 }
  0x21   :  { %1418 = shalt.err (!%p1415_p1)
}
  0x22   :  { %22 = dma.hbm_to_vmem [thread:$0]  %s1656_s0, 128, %s1499_s15, [#allocation3], %s1471_s24, %s1471_s24, %s1472_s25  }
  0x23   :  { %s1473_s10 = smov [#allocation7]   ;;  %s1419_s14 = scalar_lea.hbm %s1658_s2, 128 }
  0x24   :  { %s41_s11 = sshll.u32 %s1473_s10, 4  ;;  %p1420_p2 = scmp.ne.s32.totalorder %s1658_s2, %s1419_s14  ;;  %s42_s11 = int_to_ptr.vmem [resolvable:$true] %s41_s11 }
  0x25   :  { %p1423_p3 = scmp.lt.u32.totalorder %s1419_s14, %s1658_s2 }
  0x27   :  { %p1425_p4 = pnand %p1423_p3, %p1420_p2 }
  0x29   :  { %1428 = shalt.err (!%p1425_p4)
}
  0x2a   :  { %s1429_s20 = scalar_lea.vmem %s42_s11, 128  ;;  %p1434_p6 = scmp.lt.s32.totalorder %s42_s11, %s42_s11 }
  0x2b   :  { %p1430_p5 = scmp.ne.s32.totalorder %s42_s11, %s1429_s20  ;;  %p1435_p7 = scmp.lt.s32.totalorder %s1429_s20, %s1429_s20 }
  0x2d   :  { %p1436_p8 = por %p1435_p7, %p1434_p6 }
  0x2f   :  { %p1437_p9 = pnand %p1436_p8, %p1430_p5 }
  0x31   :  { %1440 = shalt.err (!%p1437_p9)
}
  0x32   :  { %44 = dma.hbm_to_vmem [thread:$0]  %s1658_s2, 128, %s42_s11, [#allocation6]  }
  0x33   :  { %1463 = dma.done.wait [#allocation3], 128  }
  0x34   :  { %1464 = vsyncadd [#allocation3], 4294967168 }
  0x35   :  { %1465 = dma.done.wait [#allocation6], 8320  }
  0x36   :  { %1466 = vsyncadd [#allocation6], 4294958976  ;;  %v1474_v0 = vmov 0.0   ;;  %vm1475_vm0 = vmmov 0   ;;  %v1310_v1 = vld [vmem:[#allocation5 + $0x40] sm:$0xff]   ;;  %v1311_v2 = vld [vmem:[#allocation5 + $0x48] sm:$0xff]  }
  0x37   :  { %1140 = vmatprep.subr.bf16.mxu0 %v1474_v0  ;;  %1156 = vmatprep.mubr.msk.bf16.mxu0 %vm1475_vm0, %v1474_v0  ;;  %v1312_v3 = vld [vmem:[#allocation5 + $0x50] sm:$0xff]   ;;  %v1313_v4 = vld [vmem:[#allocation5 + $0x58] sm:$0xff]   ;;  %v1314_v5 = vld [vmem:[#allocation5 + $0x60] sm:$0xff]   ;;  %s1476_s2 = smov [#allocation8]  }
  0x38   :  { %1160 = vmatprep.subr.bf16.mxu1 %v1474_v0  ;;  %1176 = vmatprep.mubr.msk.bf16.mxu1 %vm1475_vm0, %v1474_v0  ;;  %v1327_v6 = vld [vmem:[#allocation5 + $0x100] sm:$0xff]   ;;  %v1315_v7 = vld [vmem:[#allocation5 + $0x68] sm:$0xff]   ;;  %v1316_v9 = vld [vmem:[#allocation5 + $0x70] sm:$0xff]   ;;  %s982_s21 = sshll.u32 %s1476_s2, 4  ;;  %s983_s21 = int_to_ptr.vmem [resolvable:$true] %s982_s21 }
  0x39   :  { %1141 = vmatpush3.bf16.msra.mxu0 %v1310_v1  ;;  %1161 = vmatpush3.bf16.msra.mxu1 %v1327_v6  ;;  %v1328_v8 = vld [vmem:[#allocation5 + $0x108] sm:$0xff]   ;;  %v1329_v10 = vld [vmem:[#allocation5 + $0x110] sm:$0xff]   ;;  %v1317_v11 = vld [vmem:[#allocation5 + $0x78] sm:$0xff]   ;;  %s1441_s22 = scalar_lea.vmem %s983_s21, 256  ;;  %p1446_p11 = scmp.lt.s32.totalorder %s983_s21, %s983_s21 }
  0x3a   :  { %1142 = vmatprep.subr.bf16.mxu0 %v1474_v0  ;;  %1162 = vmatprep.subr.bf16.mxu1 %v1474_v0  ;;  %v1330_v12 = vld [vmem:[#allocation5 + $0x118] sm:$0xff]   ;;  %v1319_v14 = vld [vmem:[#allocation5] sm:$0xff]   ;;  %v1320_v16 = vld [vmem:[#allocation5 + $0x8] sm:$0xff]   ;;  %p1442_p10 = scmp.ne.s32.totalorder %s983_s21, %s1441_s22  ;;  %p1447_p12 = scmp.lt.s32.totalorder %s1441_s22, %s1441_s22 }
  0x3b   :  { %v1318_v13 = vld [vmem:[#allocation2] sm:$0xff]   ;;  %v1331_v15 = vld [vmem:[#allocation5 + $0x120] sm:$0xff]   ;;  %v1332_v17 = vld [vmem:[#allocation5 + $0x128] sm:$0xff]  }
  0x3c   :  { %v1321_v18 = vld [vmem:[#allocation5 + $0x10] sm:$0xff]   ;;  %v1322_v19 = vld [vmem:[#allocation5 + $0x18] sm:$0xff]   ;;  %v1323_v20 = vld [vmem:[#allocation5 + $0x20] sm:$0xff]   ;;  %p1448_p13 = por %p1447_p12, %p1446_p11 }
  0x3d   :  { %1143 = vmatpush3.bf16.msra.mxu0 %v1311_v2  ;;  %1163 = vmatpush3.bf16.msra.mxu1 %v1328_v8  ;;  %v1324_v21 = vld [vmem:[#allocation5 + $0x28] sm:$0xff]   ;;  %v1325_v22 = vld [vmem:[#allocation5 + $0x30] sm:$0xff]   ;;  %v1326_v23 = vld [vmem:[#allocation5 + $0x38] sm:$0xff]  }
  0x3e   :  { %1144 = vmatprep.subr.bf16.mxu0 %v1474_v0  ;;  %1164 = vmatprep.subr.bf16.mxu1 %v1474_v0  ;;  %v1333_v24 = vld [vmem:[#allocation5 + $0x130] sm:$0xff]   ;;  %v1334_v25 = vld [vmem:[#allocation5 + $0x138] sm:$0xff]   ;;  %v1335_v26 = vld [vmem:[#allocation5 + $0x80] sm:$0xff]   ;;  %p1449_p0 = pnand %p1448_p13, %p1442_p10 }
  0x3f   :  { %v1336_v27 = vld [vmem:[#allocation5 + $0x88] sm:$0xff]   ;;  %v1337_v28 = vld [vmem:[#allocation5 + $0x90] sm:$0xff]   ;;  %v1338_v29 = vld [vmem:[#allocation5 + $0x98] sm:$0xff]  }
  0x40   :  { %v1339_v30 = vld [vmem:[#allocation5 + $0xa0] sm:$0xff]   ;;  %v1340_v31 = vld [vmem:[#allocation5 + $0xa8] sm:$0xff]   ;;  %v1341_v32 = vld [vmem:[#allocation5 + $0xb0] sm:$0xff]  }
  0x41   :  { %1145 = vmatpush3.bf16.msra.mxu0 %v1312_v3  ;;  %1165 = vmatpush3.bf16.msra.mxu1 %v1329_v10  ;;  %v1342_v33 = vld [vmem:[#allocation5 + $0xb8] sm:$0xff]   ;;  %v1343_v34 = vld [vmem:[#allocation5 + $0xc0] sm:$0xff]   ;;  %v1344_v35 = vld [vmem:[#allocation5 + $0xc8] sm:$0xff]  }
  0x42   :  { %1146 = vmatprep.subr.bf16.mxu0 %v1474_v0  ;;  %1166 = vmatprep.subr.bf16.mxu1 %v1474_v0  ;;  %v1345_v36 = vld [vmem:[#allocation5 + $0xd0] sm:$0xff]   ;;  %v1346_v37 = vld [vmem:[#allocation5 + $0xd8] sm:$0xff]   ;;  %v1347_v38 = vld [vmem:[#allocation5 + $0xe0] sm:$0xff]  }
  0x43   :  { %v1014_v43 = vld [vmem:[#allocation7] ss:$0 sm:$0xff]  ;;  %v1348_v57 = vld [vmem:[#allocation5 + $0xe8] sm:$0xff]   ;;  %v1349_v58 = vld [vmem:[#allocation5 + $0xf0] sm:$0xff]  }
  0x44   :  { %v1350_v59 = vld [vmem:[#allocation5 + $0xf8] sm:$0xff]   ;;  %v1351_v60 = vld [vmem:[#allocation5 + $0x140] sm:$0xff]   ;;  %v1352_v61 = vld [vmem:[#allocation5 + $0x148] sm:$0xff]  }
  0x45   :  { %1147 = vmatpush3.bf16.msra.mxu0 %v1313_v4  ;;  %1167 = vmatpush3.bf16.msra.mxu1 %v1330_v12  ;;  %v1353_v62 = vld [vmem:[#allocation5 + $0x150] sm:$0xff]   ;;  %v1354_v63 = vld [vmem:[#allocation5 + $0x158] sm:$0xff]   ;;  %v1355_v1 = vld [vmem:[#allocation5 + $0x160] sm:$0xff]  }
  0x46   :  { %1148 = vmatprep.subr.bf16.mxu0 %v1474_v0  ;;  %1168 = vmatprep.subr.bf16.mxu1 %v1474_v0  ;;  %v995_v2 = vld [vmem:[#allocation7 + $0x1] ss:$0 sm:$0xff]  ;;  %v1023_v4 = vld [vmem:[#allocation7 + $0x2] ss:$0 sm:$0xff] }
  0x49   :  { %1149 = vmatpush3.bf16.msra.mxu0 %v1314_v5  ;;  %1169 = vmatpush3.bf16.msra.mxu1 %v1331_v15 }
  0x4a   :  { %1150 = vmatprep.subr.bf16.mxu0 %v1474_v0  ;;  %1170 = vmatprep.subr.bf16.mxu1 %v1474_v0 }
  0x4d   :  { %1151 = vmatpush3.bf16.msra.mxu0 %v1315_v7  ;;  %1171 = vmatpush3.bf16.msra.mxu1 %v1332_v17 }
  0x4e   :  { %1152 = vmatprep.subr.bf16.mxu0 %v1474_v0  ;;  %1172 = vmatprep.subr.bf16.mxu1 %v1474_v0 }
  0x51   :  { %1153 = vmatpush3.bf16.msra.mxu0 %v1316_v9  ;;  %1173 = vmatpush3.bf16.msra.mxu1 %v1333_v24  ;;  %v1361_v24 = vld [vmem:[#allocation5 + $0x190] sm:$0xff]  }
  0x52   :  { %1154 = vmatprep.subr.bf16.mxu0 %v1474_v0  ;;  %1174 = vmatprep.subr.bf16.mxu1 %v1474_v0 }
  0x55   :  { %1155 = vmatpush3.bf16.msra.mxu0 %v1317_v11  ;;  %1175 = vmatpush3.bf16.msra.mxu1 %v1334_v25  ;;  %v1362_v25 = vld [vmem:[#allocation5 + $0x198] sm:$0xff]  }
  0x56   :  { %1180 = vmatprep.subr.bf16.mxu0 %v1474_v0  ;;  %1200 = vmatprep.subr.bf16.mxu1 %v1474_v0 }
  0x58   :  { %1157 = vmatmul.mubr.bf16.vlgmr.msra.gmra.mrb[0].mxu0 %v1318_v13  ;;  %1177 = vmatmul.mubr.bf16.vlgmr.msra.gmra.mrb[0].mxu1 %v1318_v13 }
  0x59   :  { %1181 = vmatpush3.bf16.msra.mxu0 %v1319_v14  ;;  %1196 = vmatprep.mubr.msk.bf16.mxu0 %vm1475_vm0, %v1474_v0 }
  0x5a   :  { %1182 = vmatprep.subr.bf16.mxu0 %v1474_v0  ;;  %1201 = vmatpush3.bf16.msra.mxu1 %v1335_v26  ;;  %v1363_v26 = vld [vmem:[#allocation5 + $0x1a0] sm:$0xff]  }
  0x5b   :  { %1216 = vmatprep.mubr.msk.bf16.mxu1 %vm1475_vm0, %v1474_v0  ;;  %1202 = vmatprep.subr.bf16.mxu1 %v1474_v0 }
  0x5d   :  { %1183 = vmatpush3.bf16.msra.mxu0 %v1320_v16 }
  0x5e   :  { %1184 = vmatprep.subr.bf16.mxu0 %v1474_v0  ;;  %1203 = vmatpush3.bf16.msra.mxu1 %v1336_v27  ;;  %v1032_v27 = vld [vmem:[#allocation7 + $0x3] ss:$0 sm:$0xff] }
  0x5f   :  { %1204 = vmatprep.subr.bf16.mxu1 %v1474_v0 }
  0x61   :  { %1185 = vmatpush3.bf16.msra.mxu0 %v1321_v18 }
  0x62   :  { %1186 = vmatprep.subr.bf16.mxu0 %v1474_v0  ;;  %1205 = vmatpush3.bf16.msra.mxu1 %v1337_v28 }
  0x63   :  { %1206 = vmatprep.subr.bf16.mxu1 %v1474_v0 }
  0x65   :  { %1187 = vmatpush3.bf16.msra.mxu0 %v1322_v19  ;;  %v1356_v19 = vld [vmem:[#allocation5 + $0x168] sm:$0xff]  }
  0x66   :  { %1188 = vmatprep.subr.bf16.mxu0 %v1474_v0  ;;  %1207 = vmatpush3.bf16.msra.mxu1 %v1338_v29 }
  0x67   :  { %1208 = vmatprep.subr.bf16.mxu1 %v1474_v0 }
  0x69   :  { %1189 = vmatpush3.bf16.msra.mxu0 %v1323_v20  ;;  %v1357_v20 = vld [vmem:[#allocation5 + $0x170] sm:$0xff]  }
  0x6a   :  { %1190 = vmatprep.subr.bf16.mxu0 %v1474_v0  ;;  %1209 = vmatpush3.bf16.msra.mxu1 %v1339_v30 }
  0x6b   :  { %1210 = vmatprep.subr.bf16.mxu1 %v1474_v0 }
  0x6d   :  { %1191 = vmatpush3.bf16.msra.mxu0 %v1324_v21  ;;  %v1358_v21 = vld [vmem:[#allocation5 + $0x178] sm:$0xff]  }
  0x6e   :  { %1192 = vmatprep.subr.bf16.mxu0 %v1474_v0  ;;  %1211 = vmatpush3.bf16.msra.mxu1 %v1340_v31 }
  0x6f   :  { %1212 = vmatprep.subr.bf16.mxu1 %v1474_v0 }
  0x71   :  { %1193 = vmatpush3.bf16.msra.mxu0 %v1325_v22  ;;  %v1359_v22 = vld [vmem:[#allocation5 + $0x180] sm:$0xff]  }
  0x72   :  { %1194 = vmatprep.subr.bf16.mxu0 %v1474_v0  ;;  %1213 = vmatpush3.bf16.msra.mxu1 %v1341_v32 }
  0x73   :  { %1214 = vmatprep.subr.bf16.mxu1 %v1474_v0 }
  0x75   :  { %1195 = vmatpush3.bf16.msra.mxu0 %v1326_v23  ;;  %v1360_v23 = vld [vmem:[#allocation5 + $0x188] sm:$0xff]  }
  0x76   :  { %1220 = vmatprep.subr.bf16.mxu0 %v1474_v0  ;;  %1215 = vmatpush3.bf16.msra.mxu1 %v1342_v33 }
  0x77   :  { %1240 = vmatprep.subr.bf16.mxu1 %v1474_v0 }
  0x78   :  { %1197 = vmatmul.mubr.bf16.vlgmr.msra.gmra.mrb[4].mxu0 %v1318_v13 }
  0x79   :  { %1236 = vmatprep.mubr.msk.bf16.mxu0 %vm1475_vm0, %v1474_v0  ;;  %1221 = vmatpush3.bf16.msra.mxu0 %v1343_v34 }
  0x7a   :  { %1222 = vmatprep.subr.bf16.mxu0 %v1474_v0 }
  0x7d   :  { %1223 = vmatpush3.bf16.msra.mxu0 %v1344_v35 }
  0x7e   :  { %1224 = vmatprep.subr.bf16.mxu0 %v1474_v0 }
  0x81   :  { %1225 = vmatpush3.bf16.msra.mxu0 %v1345_v36 }
  0x82   :  { %1226 = vmatprep.subr.bf16.mxu0 %v1474_v0 }
  0x85   :  { %1227 = vmatpush3.bf16.msra.mxu0 %v1346_v37 }
  0x86   :  { %1228 = vmatprep.subr.bf16.mxu0 %v1474_v0 }
  0x89   :  { %1229 = vmatpush3.bf16.msra.mxu0 %v1347_v38 }
  0x8a   :  { %1230 = vmatprep.subr.bf16.mxu0 %v1474_v0 }
  0x8d   :  { %1231 = vmatpush3.bf16.msra.mxu0 %v1348_v57 }
  0x8e   :  { %1232 = vmatprep.subr.bf16.mxu0 %v1474_v0 }
  0x91   :  { %1233 = vmatpush3.bf16.msra.mxu0 %v1349_v58 }
  0x92   :  { %1234 = vmatprep.subr.bf16.mxu0 %v1474_v0 }
  0x95   :  { %1235 = vmatpush3.bf16.msra.mxu0 %v1350_v59 }
  0x96   :  { %1260 = vmatprep.subr.bf16.mxu0 %v1474_v0 }
 0x12b   :  { %v167_v39 = vpop.f32.mrb[0].mxu0  ;;  %v1599_v53 = vpop.f32.mrb[0].mxu1 }
 0x12c   :  { %v1158_v40 = vpop.f32.mrb[1].mxu0  ;;  %v1178_v54 = vpop.f32.mrb[1].mxu1  ;;  %v168_v3 = vadd.f32 %v995_v2, %v167_v39  ;;  %v1364_v39 = vld [vmem:[#allocation5 + $0x1a8] sm:$0xff]  }
 0x12d   :  { %v170_v41 = vpop.f32.mrb[2].mxu0  ;;  %v1601_v55 = vpop.f32.mrb[2].mxu1  ;;  %v1365_v40 = vld [vmem:[#allocation5 + $0x1b0] sm:$0xff]  }
 0x12e   :  { %v1159_v42 = vpop.f32.mrb[3].mxu0  ;;  %v1179_v56 = vpop.f32.mrb[3].mxu1  ;;  %v171_v5 = vadd.f32 %v995_v2, %v170_v41  ;;  %v174_v7 = vmax.f32 %v168_v3, 0.0  ;;  %v1366_v41 = vld [vmem:[#allocation5 + $0x1b8] sm:$0xff]  }
 0x12f   :  { %v1367_v42 = vld [vmem:[#allocation5 + $0x1c0] sm:$0xff]  }
 0x130   :  { %v175_v11 = vmax.f32 %v171_v5, 0.0 }
 0x14b   :  { %v392_v44 = vpop.f32.mrb[4].mxu0 }
 0x14c   :  { %v1591_v45 = vadd.f32 %v1014_v43, %v392_v44  ;;  %v1198_v46 = vpop.f32.mrb[5].mxu0  ;;  %v1369_v44 = vld [vmem:[#allocation5 + $0x1d0] sm:$0xff]  }
 0x14d   :  { %v395_v47 = vpop.f32.mrb[6].mxu0  ;;  %v1371_v46 = vld [vmem:[#allocation5 + $0x1e0] sm:$0xff]  }
 0x14e   :  { %v1593_v48 = vadd.f32 %v1014_v43, %v395_v47  ;;  %v1199_v49 = vpop.f32.mrb[7].mxu0  ;;  %v399_v50 = vmax.f32 %v1591_v45, 0.0  ;;  %v1368_v43 = vld [vmem:[#allocation5 + $0x1c8] sm:$0xff]  }
 0x14f   :  { %v1372_v47 = vld [vmem:[#allocation5 + $0x1e8] sm:$0xff]  }
 0x150   :  { %v400_v51 = vmax.f32 %v1593_v48, 0.0 }
 0x152   :  { %v401_v52 = vpack.c.bf16 %v400_v51, %v399_v50  ;;  %v1041_v50 = vld [vmem:[#allocation7 + $0x5] ss:$0 sm:$0xff] }
 0x154   :  { %1217 = vmatmul.mubr.bf16.vlgmr.msra.gmra.mrb[4].mxu1 %v401_v52 }
 0x155   :  { %1256 = vmatprep.mubr.msk.bf16.mxu1 %vm1475_vm0, %v1474_v0  ;;  %1241 = vmatpush3.bf16.msra.mxu1 %v1351_v60 }
 0x156   :  { %1242 = vmatprep.subr.bf16.mxu1 %v1474_v0 }
 0x159   :  { %1243 = vmatpush3.bf16.msra.mxu1 %v1352_v61 }
 0x15a   :  { %1244 = vmatprep.subr.bf16.mxu1 %v1474_v0 }
 0x15d   :  { %1245 = vmatpush3.bf16.msra.mxu1 %v1353_v62 }
 0x15e   :  { %1246 = vmatprep.subr.bf16.mxu1 %v1474_v0 }
 0x161   :  { %1247 = vmatpush3.bf16.msra.mxu1 %v1354_v63 }
 0x162   :  { %1248 = vmatprep.subr.bf16.mxu1 %v1474_v0 }
 0x165   :  { %1249 = vmatpush3.bf16.msra.mxu1 %v1355_v1 }
 0x166   :  { %1250 = vmatprep.subr.bf16.mxu1 %v1474_v0 }
 0x169   :  { %1251 = vmatpush3.bf16.msra.mxu1 %v1356_v19 }
 0x16a   :  { %1252 = vmatprep.subr.bf16.mxu1 %v1474_v0 }
 0x16d   :  { %1253 = vmatpush3.bf16.msra.mxu1 %v1357_v20 }
 0x16e   :  { %1254 = vmatprep.subr.bf16.mxu1 %v1474_v0 }
 0x171   :  { %1255 = vmatpush3.bf16.msra.mxu1 %v1358_v21 }
 0x172   :  { %1280 = vmatprep.subr.bf16.mxu1 %v1474_v0 }
 0x227   :  { %v506_v6 = vpop.f32.mrb[4].mxu1 }
 0x228   :  { %v507_v8 = vadd.f32 %v1023_v4, %v506_v6  ;;  %v1218_v9 = vpop.f32.mrb[5].mxu1 }
 0x229   :  { %v509_v10 = vpop.f32.mrb[6].mxu1 }
 0x22a   :  { %v513_v12 = vadd.f32 %v507_v8, %v174_v7  ;;  %v510_v13 = vadd.f32 %v1023_v4, %v509_v10  ;;  %v1219_v14 = vpop.f32.mrb[7].mxu1  ;;  %v1373_v4 = vld [vmem:[#allocation5 + $0x1f0] sm:$0xff]  }
 0x22b   :  { %v1059_v14 = vld [vmem:[#allocation7 + $0x7] ss:$0 sm:$0xff] }
 0x22c   :  { %v514_v15 = vadd.f32 %v510_v13, %v175_v11  ;;  %v515_v16 = vmax.f32 %v513_v12, 0.0 }
 0x22e   :  { %v516_v17 = vmax.f32 %v514_v15, 0.0 }
 0x230   :  { %v517_v18 = vpack.c.bf16 %v516_v17, %v515_v16 }
 0x232   :  { %1237 = vmatmul.mubr.bf16.vlgmr.msra.gmra.mrb[8].mxu0 %v517_v18 }
 0x233   :  { %1276 = vmatprep.mubr.msk.bf16.mxu0 %vm1475_vm0, %v1474_v0  ;;  %1261 = vmatpush3.bf16.msra.mxu0 %v1359_v22 }
 0x234   :  { %1262 = vmatprep.subr.bf16.mxu0 %v1474_v0 }
 0x237   :  { %1263 = vmatpush3.bf16.msra.mxu0 %v1360_v23 }
 0x238   :  { %1264 = vmatprep.subr.bf16.mxu0 %v1474_v0 }
 0x23b   :  { %1265 = vmatpush3.bf16.msra.mxu0 %v1361_v24 }
 0x23c   :  { %1266 = vmatprep.subr.bf16.mxu0 %v1474_v0 }
 0x23f   :  { %1267 = vmatpush3.bf16.msra.mxu0 %v1362_v25 }
 0x240   :  { %1268 = vmatprep.subr.bf16.mxu0 %v1474_v0 }
 0x243   :  { %1269 = vmatpush3.bf16.msra.mxu0 %v1363_v26 }
 0x244   :  { %1270 = vmatprep.subr.bf16.mxu0 %v1474_v0 }
 0x247   :  { %1271 = vmatpush3.bf16.msra.mxu0 %v1364_v39 }
 0x248   :  { %1272 = vmatprep.subr.bf16.mxu0 %v1474_v0 }
 0x24b   :  { %1273 = vmatpush3.bf16.msra.mxu0 %v1365_v40 }
 0x24c   :  { %1274 = vmatprep.subr.bf16.mxu0 %v1474_v0 }
 0x24f   :  { %1275 = vmatpush3.bf16.msra.mxu0 %v1366_v41 }
 0x305   :  { %v622_v28 = vpop.f32.mrb[8].mxu0 }
 0x306   :  { %v623_v29 = vadd.f32 %v1032_v27, %v622_v28  ;;  %v1238_v30 = vpop.f32.mrb[9].mxu0 }
 0x307   :  { %v625_v31 = vpop.f32.mrb[10].mxu0 }
 0x308   :  { %v1622_v32 = vadd.f32 %v623_v29, %v1591_v45  ;;  %v626_v33 = vadd.f32 %v1032_v27, %v625_v31  ;;  %v1239_v34 = vpop.f32.mrb[11].mxu0  ;;  %v1370_v45 = vld [vmem:[#allocation5 + $0x1d8] sm:$0xff]  }
 0x30a   :  { %v1625_v35 = vadd.f32 %v626_v33, %v1593_v48  ;;  %v631_v36 = vmax.f32 %v1622_v32, 0.0  ;;  %v1005_v48 = vld [vmem:[#allocation7 + $0x4] ss:$0 sm:$0xff] }
 0x30b   :  { %v281_v49 = vadd.f32 %v1005_v48, %v1599_v53  ;;  %v284_v51 = vadd.f32 %v1005_v48, %v1601_v55  ;;  %v1374_v53 = vld [vmem:[#allocation5 + $0x1f8] sm:$0xff]   ;;  %v1050_v55 = vld [vmem:[#allocation7 + $0x6] ss:$0 sm:$0xff] }
 0x30c   :  { %v632_v37 = vmax.f32 %v1625_v35, 0.0 }
 0x30d   :  { %v287_v54 = vmax.f32 %v281_v49, 0.0  ;;  %v288_v59 = vmax.f32 %v284_v51, 0.0 }
 0x30e   :  { %v633_v38 = vpack.c.bf16 %v632_v37, %v631_v36 }
 0x310   :  { %1257 = vmatmul.mubr.bf16.vlgmr.msra.gmra.mrb[8].mxu1 %v633_v38 }
 0x311   :  { %1296 = vmatprep.mubr.msk.bf16.mxu1 %vm1475_vm0, %v1474_v0  ;;  %1281 = vmatpush3.bf16.msra.mxu1 %v1367_v42 }
 0x312   :  { %1282 = vmatprep.subr.bf16.mxu1 %v1474_v0 }
 0x315   :  { %1283 = vmatpush3.bf16.msra.mxu1 %v1368_v43 }
 0x316   :  { %1284 = vmatprep.subr.bf16.mxu1 %v1474_v0 }
 0x319   :  { %1285 = vmatpush3.bf16.msra.mxu1 %v1369_v44 }
 0x31a   :  { %1286 = vmatprep.subr.bf16.mxu1 %v1474_v0 }
 0x31d   :  { %1287 = vmatpush3.bf16.msra.mxu1 %v1370_v45 }
 0x31e   :  { %1288 = vmatprep.subr.bf16.mxu1 %v1474_v0 }
 0x321   :  { %1289 = vmatpush3.bf16.msra.mxu1 %v1371_v46 }
 0x322   :  { %1290 = vmatprep.subr.bf16.mxu1 %v1474_v0 }
 0x325   :  { %1291 = vmatpush3.bf16.msra.mxu1 %v1372_v47 }
 0x326   :  { %1292 = vmatprep.subr.bf16.mxu1 %v1474_v0 }
 0x329   :  { %1293 = vmatpush3.bf16.msra.mxu1 %v1373_v4 }
 0x32a   :  { %1294 = vmatprep.subr.bf16.mxu1 %v1474_v0 }
 0x32d   :  { %1295 = vmatpush3.bf16.msra.mxu1 %v1374_v53 }
 0x3e3   :  { %v738_v52 = vpop.f32.mrb[8].mxu1 }
 0x3e4   :  { %v739_v56 = vadd.f32 %v1041_v50, %v738_v52  ;;  %v1258_v57 = vpop.f32.mrb[9].mxu1 }
 0x3e5   :  { %v741_v58 = vpop.f32.mrb[10].mxu1 }
 0x3e6   :  { %v745_v60 = vadd.f32 %v739_v56, %v287_v54  ;;  %v742_v61 = vadd.f32 %v1041_v50, %v741_v58  ;;  %v1259_v62 = vpop.f32.mrb[11].mxu1 }
 0x3e8   :  { %v746_v63 = vadd.f32 %v742_v61, %v288_v59  ;;  %v747_v1 = vmax.f32 %v745_v60, 0.0 }
 0x3ea   :  { %v748_v2 = vmax.f32 %v746_v63, 0.0 }
 0x3ec   :  { %v749_v3 = vpack.c.bf16 %v748_v2, %v747_v1 }
 0x3ee   :  { %1277 = vmatmul.mubr.bf16.vlgmr.msra.gmra.mrb[12].mxu0 %v749_v3 }
 0x4c1   :  { %v854_v5 = vpop.f32.mrb[12].mxu0 }
 0x4c2   :  { %v855_v6 = vadd.f32 %v1050_v55, %v854_v5  ;;  %v1278_v7 = vpop.f32.mrb[13].mxu0 }
 0x4c3   :  { %v857_v8 = vpop.f32.mrb[14].mxu0 }
 0x4c4   :  { %v858_v9 = vadd.f32 %v1050_v55, %v857_v8  ;;  %v1279_v10 = vpop.f32.mrb[15].mxu0  ;;  %v861_v11 = vadd.f32 %v855_v6, %v1622_v32 }
 0x4c6   :  { %v862_v12 = vadd.f32 %v858_v9, %v1625_v35 }
 0x4c8   :  { %v863_v13 = vpack.c.bf16 %v862_v12, %v861_v11 }
 0x4ca   :  { %1297 = vmatmul.mubr.bf16.vlgmr.msra.gmra.mrb[12].mxu1 %v863_v13 }
 0x59d   :  { %v968_v15 = vpop.f32.mrb[12].mxu1 }
 0x59e   :  { %v969_v0 = vadd.f32 %v1059_v14, %v968_v15  ;;  %v1298_v16 = vpop.f32.mrb[13].mxu1 }
 0x59f   :  { %v971_v17 = vpop.f32.mrb[14].mxu1 }
 0x5a0   :  { %975 = vst [vmem:[#allocation8] sm:$0xff] %v969_v0  ;;  %v972_v18 = vadd.f32 %v1059_v14, %v971_v17  ;;  %v1299_v19 = vpop.f32.mrb[15].mxu1 }
 0x5a2   :  { %976 = vst [vmem:[#allocation8 + $0x8] sm:$0xff] %v972_v18 }
 0x5a3   :  { %1452 = shalt.err (!%p1449_p0)
}
 0x5a4   :  { %s1453_s25 = scalar_lea.hbm %s1659_s3, 256 }
 0x5a5   :  { %p1454_p1 = scmp.ne.s32.totalorder %s1659_s3, %s1453_s25  ;;  %p1457_p2 = scmp.lt.u32.totalorder %s1453_s25, %s1659_s3 }
 0x5a7   :  { %p1459_p3 = pnand %p1457_p2, %p1454_p1 }
 0x5a9   :  { %1462 = shalt.err (!%p1459_p3)
}
 0x5aa   :  { %s1477_s30 = smov 128   ;;  %s1478_s4 = smov 8  }
 0x5ab   :  { %988 = dma.vmem_to_hbm [thread:$0]  %s983_s21, 256, %s1659_s3, [#allocation4], %s1477_s30, %s1477_s30, %s1478_s4  }
 0x5ac   :  { %1467 = dma.done.wait [#allocation4], 256  }
 0x5ad   :  { %1468 = vsyncadd [#allocation4], 4294967040 }
 0x5ae   :  { %992 = vsyncpa [#allocation3], 1 }
 0x5af   :  { %993 = vsyncpa [#allocation6], 1 }
 0x5b0   :  { %994 = vsyncpa [#allocation4], 1 }

</bundles_post_ra>
